<compile_context>
chip_gen: v6e
topology: v6e:2x2x1
jax: 0.10.0
libtpu: 0.0.40
codegen_flags: <defaults>
</compile_context>

<pallas_src>
import jax
import jax.numpy as jnp
from jax.experimental import pallas as pl
from jax.experimental.pallas import tpu as pltpu


def _round_up(n, m):
    return ((n + m - 1) // m) * m


def san_kernel(x_ref, w1_ref, b1_ref, w2_ref, b2_ref, o_ref):
    # ad_layer1: (TB, D) @ (D, 256)  -- bf16 operands, f32 accumulation on the MXU.
    h = jnp.dot(x_ref[...], w1_ref[...], preferred_element_type=jnp.float32)
    # bias + relu1 (f32, VPU)
    h = jnp.maximum(h + b1_ref[...], 0.0)
    # dropout1: eval mode -> identity.
    # ad_layer2: w2 is a (1, 256) row; use VPU multiply + lane reduction instead of a
    # degenerate N=1 MXU matmul.  b2 is a scalar read from SMEM.
    z = jnp.sum(h * w2_ref[...], axis=-1, keepdims=True) + b2_ref[0]
    # sigmoid (exact; exp issues on the otherwise-idle EUP slot)
    o_ref[...] = 1.0 / (1.0 + jnp.exp(-z))


def small_adversarial_network(x, w1, b1, w2, b2, *, block_rows=1024, use_bf16=True):
    """SmallAdversarialNetwork forward.

    Args:
      x : (B, D)   float32 input batch.
      w1: (D, 256) float32 -- ad_layer1.weight transposed (PyTorch stores (out, in)).
      b1: (256,)   float32 -- ad_layer1.bias.
      w2: (256,)   float32 -- ad_layer2.weight squeezed.
      b2: ()       float32 -- ad_layer2.bias.
      block_rows: batch tile size (rows per grid step).
      use_bf16: cast x / w1 to bf16 for the MXU (f32 accumulation).

    Returns:
      (B, 1) float32 in [0, 1].
    """
    B, D = x.shape
    H = w1.shape[1]
    assert w1.shape == (D, H)

    # --- batch tiling ------------------------------------------------------
    TB = min(int(block_rows), _round_up(B, 8))
    TB = _round_up(TB, 8)
    B_pad = _round_up(B, TB)
    if B_pad != B:
        x = jnp.pad(x, ((0, B_pad - B), (0, 0)))
    num_blocks = B_pad // TB

    # --- dtype / layout plumbing (wrapper side) -----------------------------
    compute_dtype = jnp.bfloat16 if use_bf16 else jnp.float32
    x_c = x.astype(compute_dtype)
    w1_c = w1.astype(compute_dtype)
    b1_2d = jnp.reshape(b1, (1, H)).astype(jnp.float32)
    w2_2d = jnp.reshape(w2, (1, H)).astype(jnp.float32)       # row layout for VPU reduce
    b2_1d = jnp.reshape(jnp.asarray(b2, jnp.float32), (1,))   # scalar -> SMEM

    out = pl.pallas_call(
        san_kernel,
        out_shape=jax.ShapeDtypeStruct((B_pad, 1), jnp.float32),
        grid_spec=pltpu.PrefetchScalarGridSpec(
            num_scalar_prefetch=0,
            grid=(num_blocks,),
            in_specs=[
                # x streams through VMEM one (TB, D) tile per grid step (pipelined).
                pl.BlockSpec((TB, D), lambda i: (i, 0)),
                # Weights / bias1 / weight2-row stay resident (constant block index).
                pl.BlockSpec((D, H), lambda i: (0, 0)),
                pl.BlockSpec((1, H), lambda i: (0, 0)),
                pl.BlockSpec((1, H), lambda i: (0, 0)),
                # Scalar bias2 lives in SMEM (no per-step VMEM block / DMA).
                pl.BlockSpec(memory_space=pltpu.MemorySpace.SMEM),
            ],
            out_specs=pl.BlockSpec((TB, 1), lambda i: (i, 0)),
        ),
        compiler_params=pltpu.CompilerParams(
            # Batch tiles are independent -> megacore-shardable on v7x.
            dimension_semantics=("parallel",),
            # Explicit scoped-VMEM budget; safe on v5e/v6e (128 MiB) and v7x (64 MiB).
            vmem_limit_bytes=32 * 1024 * 1024,
        ),
    )(x_c, w1_c, b1_2d, w2_2d, b2_1d)

    return out[:B]


if __name__ == "__main__":
    # Small shapes consistent with the module: in_feature=64, hidden=256 (fixed by the
    # module), batch=256.  block_rows=128 -> 2 grid steps, exercising the tiled path.
    B, D, H = 256, 64, 256

    key = jax.random.PRNGKey(0)
    kx, kw1, kw2 = jax.random.split(key, 3)

    x = jax.random.normal(kx, (B, D), dtype=jnp.float32)

    # Parameter init matching the module's __init__: weights ~ N(0, 0.01), biases = 0.
    w1 = 0.01 * jax.random.normal(kw1, (D, H), dtype=jnp.float32)
    b1 = jnp.zeros((H,), dtype=jnp.float32)
    w2 = 0.01 * jax.random.normal(kw2, (H,), dtype=jnp.float32)
    b2 = jnp.float32(0.0)

    out = small_adversarial_network(x, w1, b1, w2, b2, block_rows=128)
    out = jax.block_until_ready(out)

    # Reference in plain JAX with the same bf16 rounding of x / w1 as the kernel
    # (eval-mode dropout = identity).
    xq = x.astype(jnp.bfloat16).astype(jnp.float32)
    w1q = w1.astype(jnp.bfloat16).astype(jnp.float32)
    h_ref = jnp.maximum(xq @ w1q + b1[None, :], 0.0)
    ref = 1.0 / (1.0 + jnp.exp(-(h_ref @ w2[:, None] + b2)))

    assert out.shape == (B, 1)
    assert jnp.allclose(out, ref, atol=1e-5, rtol=1e-5), float(jnp.max(jnp.abs(out - ref)))

    print("KERNEL_OK")
</pallas_src>

<mosaic_0001>
module attributes {stable_mosaic.version = 11 : i64} {
  func.func @san_kernel(%arg0: i32, %arg1: memref<128x64xbf16, #tpu.memory_space<vmem>>, %arg2: memref<64x256xbf16, #tpu.memory_space<vmem>>, %arg3: memref<1x256xf32, #tpu.memory_space<vmem>>, %arg4: memref<1x256xf32, #tpu.memory_space<vmem>>, %arg5: memref<1xf32, #tpu.memory_space<smem>>, %arg6: memref<128x1xf32, #tpu.memory_space<vmem>>) attributes {dimension_semantics = [#tpu.dimension_semantics<parallel>], iteration_bounds = array<i64: 2>, scalar_prefetch = 0 : i64, scratch_operands = 0 : i64, tpu.core_type = #tpu.core_type<tc>, window_params = [{transform_indices = @transform_0, window_bounds = array<i64: 128, 64>}, {pipeline_mode = #tpu.pipeline_mode<synchronous>, transform_indices = @transform_1, window_bounds = array<i64: 64, 256>}, {pipeline_mode = #tpu.pipeline_mode<synchronous>, transform_indices = @transform_2, window_bounds = array<i64: 1, 256>}, {pipeline_mode = #tpu.pipeline_mode<synchronous>, transform_indices = @transform_3, window_bounds = array<i64: 1, 256>}, {transform_indices = @transform_4, window_bounds = array<i64: 1>}, {transform_indices = @transform_5, window_bounds = array<i64: 128, 1>}]} {
    %c0 = arith.constant 0 : index
    %c0_0 = arith.constant 0 : index
    %0 = vector.load %arg1[%c0, %c0_0] : memref<128x64xbf16, #tpu.memory_space<vmem>>, vector<128x64xbf16>
    %c0_1 = arith.constant 0 : index
    %c0_2 = arith.constant 0 : index
    %1 = vector.load %arg2[%c0_1, %c0_2] : memref<64x256xbf16, #tpu.memory_space<vmem>>, vector<64x256xbf16>
    %cst = arith.constant dense<0.000000e+00> : vector<128x256xf32>
    %2 = tpu.matmul %0, %1, %cst {dimension_numbers = #tpu.dot_dimension_numbers<[1], [0], [0], [1], [0, 0, 1, 1], [], []>} : vector<128x64xbf16>, vector<64x256xbf16>, vector<128x256xf32> -> vector<128x256xf32>
    %c0_3 = arith.constant 0 : index
    %c0_4 = arith.constant 0 : index
    %3 = vector.load %arg3[%c0_3, %c0_4] : memref<1x256xf32, #tpu.memory_space<vmem>>, vector<1x256xf32>
    %4 = vector.broadcast %3 : vector<1x256xf32> to vector<128x256xf32>
    %5 = arith.addf %2, %4 : vector<128x256xf32>
    %cst_5 = arith.constant 0.000000e+00 : f32
    %6 = vector.broadcast %cst_5 : f32 to vector<128x256xf32>
    %7 = arith.maximumf %5, %6 : vector<128x256xf32>
    %c0_6 = arith.constant 0 : index
    %c0_7 = arith.constant 0 : index
    %8 = vector.load %arg4[%c0_6, %c0_7] : memref<1x256xf32, #tpu.memory_space<vmem>>, vector<1x256xf32>
    %9 = vector.broadcast %8 : vector<1x256xf32> to vector<128x256xf32>
    %10 = arith.mulf %7, %9 : vector<128x256xf32>
    %cst_8 = arith.constant dense<0.000000e+00> : vector<128xf32>
    %11 = vector.multi_reduction <add>, %10, %cst_8 [1] : vector<128x256xf32> to vector<128xf32>
    %12 = vector.shape_cast %11 : vector<128xf32> to vector<128x1xf32>
    %c0_9 = arith.constant 0 : index
    %13 = memref.load %arg5[%c0_9] : memref<1xf32, #tpu.memory_space<smem>>
    %14 = vector.broadcast %13 : f32 to vector<128x1xf32>
    %15 = arith.addf %12, %14 : vector<128x1xf32>
    %cst_10 = arith.constant 0.000000e+00 : f32
    %16 = vector.broadcast %cst_10 : f32 to vector<128x1xf32>
    %17 = arith.subf %16, %15 : vector<128x1xf32>
    %18 = math.exp %17 : vector<128x1xf32>
    %cst_11 = arith.constant 1.000000e+00 : f32
    %19 = vector.broadcast %cst_11 : f32 to vector<128x1xf32>
    %20 = arith.addf %19, %18 : vector<128x1xf32>
    %cst_12 = arith.constant 1.000000e+00 : f32
    %21 = vector.broadcast %cst_12 : f32 to vector<128x1xf32>
    %22 = arith.divf %21, %20 : vector<128x1xf32>
    %c0_13 = arith.constant 0 : index
    %c0_14 = arith.constant 0 : index
    %23 = vector.load %arg6[%c0_13, %c0_14] : memref<128x1xf32, #tpu.memory_space<vmem>>, vector<128x1xf32>
    tpu.vector_store %arg6[%c0_13, %c0_14], %22 {strides = array<i32>} : memref<128x1xf32, #tpu.memory_space<vmem>>, vector<128x1xf32>,
    return
  }
  func.func @transform_0(%arg0: i32) -> (i32, i32) {
    %c0_i32 = arith.constant 0 : i32
    %c0_i32_0 = arith.constant 0 : i32
    return %arg0, %c0_i32 : i32, i32
  }
  func.func @transform_1(%arg0: i32) -> (i32, i32) {
    %c0_i32 = arith.constant 0 : i32
    %c0_i32_0 = arith.constant 0 : i32
    %c0_i32_1 = arith.constant 0 : i32
    return %c0_i32, %c0_i32_0 : i32, i32
  }
  func.func @transform_2(%arg0: i32) -> (i32, i32) {
    %c0_i32 = arith.constant 0 : i32
    %c0_i32_0 = arith.constant 0 : i32
    %c0_i32_1 = arith.constant 0 : i32
    return %c0_i32, %c0_i32_0 : i32, i32
  }
  func.func @transform_3(%arg0: i32) -> (i32, i32) {
    %c0_i32 = arith.constant 0 : i32
    %c0_i32_0 = arith.constant 0 : i32
    %c0_i32_1 = arith.constant 0 : i32
    return %c0_i32, %c0_i32_0 : i32, i32
  }
  func.func @transform_4(%arg0: i32) -> i32 {
    %c0_i32 = arith.constant 0 : i32
    %c0_i32_0 = arith.constant 0 : i32
    return %c0_i32 : i32
  }
  func.func @transform_5(%arg0: i32) -> (i32, i32) {
    %c0_i32 = arith.constant 0 : i32
    %c0_i32_0 = arith.constant 0 : i32
    return %arg0, %c0_i32 : i32, i32
  }
}

</mosaic_0001>

<bundles_post_ra>
// kernel: tpu_custom_call.1
= control target key start
LH: loop header
LB: loop body
LE: loop exit
PB: predicated region body
PF: predicated region fallthrough
CT: control target
= control target key end

     0   :  { %s973_s20 = smov 0   ;;  %s1166_s0 = inlined_call_operand.vmem [shape: bf16[256,64], index: 0, kind: input, shape index: {}]   ;;  %s1167_s1 = inlined_call_operand.vmem [shape: bf16[64,256], index: 1, kind: input, shape index: {}]   ;;  %s1168_s2 = inlined_call_operand.vmem [shape: f32[1,256], index: 2, kind: input, shape index: {}]   ;;  %s1169_s3 = inlined_call_operand.vmem [shape: f32[1,256], index: 3, kind: input, shape index: {}]   ;;  %s1170_s4 = inlined_call_operand.<no memory space> [shape: f32[1], index: 4, kind: input, shape index: {}]   ;;  %s1171_s5 = inlined_call_operand.vmem [shape: f32[256,1], index: 5, kind: output, shape index: {}]  }
   0x1   :  { %10 = sst [smem:[#allocation2]] %s1170_s4 }
   0x2 LB: > { %s795_s21 = sadd.s32 4294967295, %s937_s20   ;;  %p799_p0 = scmp.ge.s32.totalorder %s937_s20, 1  ;;  %s937_s20 = sphi %s973_s20, %s16_s20  }
   0x3   : > { %p189_p1 = scmp.lt.s32.totalorder %s937_s20, 3 }
   0x5   : > { %p190_p2 = pnand %p799_p0, %p189_p1 }
   0x6   : > { %s800_s4 = sshll.u32 (!%p190_p2), %s795_s21, 4  ;;  %s608_s22 = sld [smem:[#allocation2]] (!%p190_p2) }
   0x7   : > { %193 = sbr.rel (%p190_p2) target bundleno = 441 (0x1b9), region = 40  ;;  %p218_p3 = scmp.lt.s32.totalorder (!%p190_p2), %s800_s4, 31 }
   0xc   : > { %v847_v0 = vld [vmem:[%s1167_s1 + $0x34] ss:$8 sps:$4 sm:$0xff]   ;;  %v849_v1 = vld [vmem:[%s1167_s1 + $0x30] ss:$8 sps:$4 sm:$0xff]   ;;  %v939_v2 = vmov 0   ;;  %s1173_s4 = smov (!%p218_p3, %s800_s4), 31  ;;  %v256_v17 = vlaneseq }
   0xd   : > { %403 = vmatprep.mubr.bf16.mxu0 %v939_v2  ;;  %443 = vmatprep.mubr.bf16.mxu1 %v939_v2  ;;  %v850_v3 = vld [vmem:[%s1167_s1 + $0x24] ss:$8 sps:$4 sm:$0xff]   ;;  %v852_v4 = vld [vmem:[%s1167_s1 + $0x20] ss:$8 sps:$4 sm:$0xff]   ;;  %v853_v5 = vld [vmem:[%s1167_s1 + $0x14] ss:$8 sps:$4 sm:$0xff]  }
   0xe   : > { %379 = vmatprep.subr.bf16.mxu0 %v847_v0  ;;  %830 = vmatprep.subr.bf16.mxu1 %v847_v0  ;;  %s801_s7 = sshll.u32 %s1173_s4, 2  ;;  %v855_v6 = vld [vmem:[%s1167_s1 + $0x10] ss:$8 sps:$4 sm:$0xff]   ;;  %v856_v7 = vld [vmem:[%s1167_s1 + $0x4] ss:$8 sps:$4 sm:$0xff]   ;;  %vm346_vm0 = vcmask 523264  }
   0xf   : > { %380 = vmatpush1.bf16.msra.mxu0 %v849_v1  ;;  %834 = vmatpush1.bf16.msra.mxu1 %v849_v1  ;;  %s1002_s10 = scalar_lea.vmem %s1166_s0, %s801_s7  ;;  %v858_v8 = vld [vmem:[%s1167_s1] ss:$8 sps:$4 sm:$0xff]   ;;  %v257_v18 = vshrl.u32 %v256_v17, 7  ;;  %s803_s23 = sshll.u32 %s1173_s4, 3  ;;  %vm722_vm1 = vcmask 7168  }
  0x10   : > { %381 = vmatprep.subr.bf16.mxu0 %v850_v3  ;;  %831 = vmatprep.subr.bf16.mxu1 %v850_v3  ;;  %v859_v9 = vld [vmem:[%s1002_s10] sm:$0xff]   ;;  %v861_v11 = vld [vmem:[%s1002_s10 + $0x8] sm:$0xff]   ;;  %v863_v13 = vld [vmem:[%s1002_s10 + $0x10] sm:$0xff]   ;;  %s1129_s26 = scalar_lea.vmem %s1171_s5, %s803_s23 }
  0x11   : > { %v860_v10 = vld [vmem:[%s1002_s10 + $0x20] sm:$0xff]   ;;  %v862_v12 = vld [vmem:[%s1002_s10 + $0x28] sm:$0xff]   ;;  %v864_v14 = vld [vmem:[%s1002_s10 + $0x30] sm:$0xff]   ;;  %v258_v19 = vsub.s32 0, %v257_v18  ;;  %v262_v21 = vsub.s32 1, %v257_v18 }
  0x12   : > { %v865_v15 = vld [vmem:[%s1002_s10 + $0x18] sm:$0xff]   ;;  %v254_v20 = vld [vmem:[%s1168_s2] sm:$0x3] }
  0x13   : > { %382 = vmatpush1.bf16.msra.mxu0 %v852_v4  ;;  %835 = vmatpush1.bf16.msra.mxu1 %v852_v4  ;;  %v866_v16 = vld [vmem:[%s1002_s10 + $0x38] sm:$0xff]   ;;  %v1032_v22 = vrot.slane %v254_v20, %v258_v19  ;;  %v1034_v23 = vrot.slane %v254_v20, %v262_v21  ;;  %v516_v27 = vld [vmem:[%s1169_s3] sm:$0x3] }
  0x14   : > { %383 = vmatprep.subr.bf16.mxu0 %v853_v5  ;;  %832 = vmatprep.subr.bf16.mxu1 %v853_v5  ;;  %v1043_v34 = vrot.slane %v516_v27, %v258_v19  ;;  %v1045_v35 = vrot.slane %v516_v27, %v262_v21 }
  0x17   : > { %384 = vmatpush1.bf16.msra.mxu0 %v855_v6  ;;  %836 = vmatpush1.bf16.msra.mxu1 %v855_v6 }
  0x18   : > { %385 = vmatprep.subr.bf16.mxu0 %v856_v7  ;;  %833 = vmatprep.subr.bf16.mxu1 %v856_v7 }
  0x1b   : > { %386 = vmatpush1.bf16.msra.mxu0 %v858_v8  ;;  %837 = vmatpush1.bf16.msra.mxu1 %v858_v8 }
  0x1e   : > { %820 = vmatmul.mubr.msk.bf16.vlgmr.msra.gmra.mxu0 %vm346_vm0, %v859_v9  ;;  %824 = vmatmul.mubr.msk.bf16.vlgmr.msra.gmra.mxu1 %vm346_vm0, %v860_v10 }
  0x1f   : > { %413 = vmatprep.mubr.bf16.mxu0 %v939_v2  ;;  %453 = vmatprep.mubr.bf16.mxu1 %v939_v2 }
  0x26   : > { %821 = vmatmul.mubr.msk.bf16.gmra.mxu0 %vm346_vm0, %v861_v11  ;;  %825 = vmatmul.mubr.msk.bf16.gmra.mxu1 %vm346_vm0, %v862_v12 }
  0x27   : > { %423 = vmatprep.mubr.bf16.mxu0 %v939_v2  ;;  %463 = vmatprep.mubr.bf16.mxu1 %v939_v2 }
  0x2e   : > { %822 = vmatmul.mubr.msk.bf16.gmra.mxu0 %vm346_vm0, %v863_v13  ;;  %826 = vmatmul.mubr.msk.bf16.gmra.mxu1 %vm346_vm0, %v864_v14 }
  0x2f   : > { %433 = vmatprep.mubr.bf16.mxu0 %v939_v2  ;;  %473 = vmatprep.mubr.bf16.mxu1 %v939_v2 }
  0x36   : > { %823 = vmatmul.mubr.msk.bf16.gmra.mxu0 %vm346_vm0, %v865_v15  ;;  %827 = vmatmul.mubr.msk.bf16.gmra.mxu1 %vm346_vm0, %v866_v16 }
  0xde   : > { %v405_v24 = vpop.f32.mrf.mxu0  ;;  %v445_v25 = vpop.f32.mrf.mxu1 }
  0xdf   : > { %v406_v26 = vadd.f32 %v405_v24, %v1032_v22  ;;  %v446_v33 = vadd.f32 %v445_v25, %v1032_v22 }
  0xe0   : > { %v407_v28 = vpop.f32.mrf.mxu0  ;;  %v447_v29 = vpop.f32.mrf.mxu1 }
  0xe1   : > { %v408_v30 = vadd.f32 %v407_v28, %v1034_v23  ;;  %v448_v31 = vadd.f32 %v447_v29, %v1034_v23  ;;  %v484_v32 = vmax.f32 %v406_v26, 0.0  ;;  %v500_v46 = vmax.f32 %v446_v33, 0.0 }
  0xe2   : > { %v409_v36 = vpop.f32.mrf.mxu0  ;;  %v449_v37 = vpop.f32.mrf.mxu1 }
  0xe3   : > { %v485_v38 = vmax.f32 %v408_v30, 0.0  ;;  %v501_v39 = vmax.f32 %v448_v31, 0.0  ;;  %v450_v40 = vadd.f32 %v449_v37, %v1032_v22  ;;  %v410_v43 = vadd.f32 %v409_v36, %v1032_v22 }
  0xe4   : > { %v411_v41 = vpop.f32.mrf.mxu0  ;;  %v451_v42 = vpop.f32.mrf.mxu1  ;;  %v528_v50 = vmul.f32 %v1043_v34, %v484_v32  ;;  %v544_v63 = vmul.f32 %v1043_v34, %v500_v46 }
  0xe5   : > { %v412_v44 = vadd.f32 %v411_v41, %v1034_v23  ;;  %v452_v45 = vadd.f32 %v451_v42, %v1034_v23  ;;  %v502_v47 = vmax.f32 %v450_v40, 0.0  ;;  %v529_v51 = vmul.f32 %v1045_v35, %v485_v38 }
  0xe6   : > { %v415_v48 = vpop.f32.mrf.mxu0  ;;  %v455_v49 = vpop.f32.mrf.mxu1  ;;  %v545_v54 = vmul.f32 %v1045_v35, %v501_v39  ;;  %v486_v60 = vmax.f32 %v410_v43, 0.0 }
  0xe7   : > { %v503_v52 = vmax.f32 %v452_v45, 0.0  ;;  %v416_v53 = vadd.f32 %v415_v48, %v1032_v22  ;;  %v487_v55 = vmax.f32 %v412_v44, 0.0  ;;  %v456_v56 = vadd.f32 %v455_v49, %v1032_v22 }
  0xe8   : > { %v417_v57 = vpop.f32.mrf.mxu0  ;;  %v457_v58 = vpop.f32.mrf.mxu1  ;;  %v560_v59 = vadd.f32 %v529_v51, %v528_v50  ;;  %v546_v3 = vmul.f32 %v1043_v34, %v502_v47  ;;  %v584_v13 = vadd.f32 %v545_v54, %v544_v63  ;;  %v530_v14 = vmul.f32 %v1043_v34, %v486_v60 }
  0xe9   : > { %v418_v61 = vadd.f32 %v417_v57, %v1034_v23  ;;  %v458_v62 = vadd.f32 %v457_v58, %v1034_v23  ;;  %v488_v0 = vmax.f32 %v416_v53, 0.0  ;;  %v547_v4 = vmul.f32 %v1045_v35, %v503_v52 }
  0xea   : > { %561 = vadd.xlane.f32.xlu0 %v560_v59  ;;  %v419_v1 = vpop.f32.mrf.mxu0  ;;  %v459_v2 = vpop.f32.mrf.mxu1  ;;  %v504_v5 = vmax.f32 %v456_v56, 0.0  ;;  %v531_v8 = vmul.f32 %v1045_v35, %v487_v55 }
  0xeb   : > { %v489_v6 = vmax.f32 %v418_v61, 0.0  ;;  %v420_v7 = vadd.f32 %v419_v1, %v1032_v22  ;;  %v505_v9 = vmax.f32 %v458_v62, 0.0  ;;  %v587_v12 = vadd.f32 %v547_v4, %v546_v3 }
  0xec   : > { %v421_v10 = vpop.f32.mrf.mxu0  ;;  %v461_v11 = vpop.f32.mrf.mxu1  ;;  %v532_v17 = vmul.f32 %v1043_v34, %v488_v0  ;;  %v460_v19 = vadd.f32 %v459_v2, %v1032_v22  ;;  %v548_v25 = vmul.f32 %v1043_v34, %v504_v5  ;;  %v563_v36 = vadd.f32 %v531_v8, %v530_v14 }
  0xed   : > { %v533_v15 = vmul.f32 %v1045_v35, %v489_v6  ;;  %v422_v16 = vadd.f32 %v421_v10, %v1034_v23  ;;  %v490_v18 = vmax.f32 %v420_v7, 0.0  ;;  %v462_v20 = vadd.f32 %v461_v11, %v1034_v23  ;;  %588 = vadd.xlane.f32.xlu1 %v587_v12 }
  0xee   : > { %585 = vadd.xlane.f32.xlu0 %v584_v13  ;;  %v425_v21 = vpop.f32.mrf.mxu0  ;;  %v465_v24 = vpop.f32.mrf.mxu1  ;;  %v549_v29 = vmul.f32 %v1045_v35, %v505_v9  ;;  %v506_v40 = vmax.f32 %v460_v19, 0.0 }
  0xef   : > { %v491_v26 = vmax.f32 %v422_v16, 0.0  ;;  %v426_v27 = vadd.f32 %v425_v21, %v1032_v22  ;;  %v466_v28 = vadd.f32 %v465_v24, %v1032_v22  ;;  %v507_v30 = vmax.f32 %v462_v20, 0.0 }
  0xf0   : > { %v427_v31 = vpop.f32.mrf.mxu0  ;;  %v467_v32 = vpop.f32.mrf.mxu1  ;;  %v566_v33 = vadd.f32 %v533_v15, %v532_v17  ;;  %v534_v39 = vmul.f32 %v1043_v34, %v490_v18  ;;  %v590_v53 = vadd.f32 %v549_v29, %v548_v25  ;;  %v550_v57 = vmul.f32 %v1043_v34, %v506_v40 }
  0xf1   : > { %v535_v37 = vmul.f32 %v1045_v35, %v491_v26  ;;  %v428_v38 = vadd.f32 %v427_v31, %v1034_v23  ;;  %v492_v41 = vmax.f32 %v426_v27, 0.0  ;;  %v468_v42 = vadd.f32 %v467_v32, %v1034_v23 }
  0xf2   : > { %567 = vadd.xlane.f32.xlu1 %v566_v33  ;;  %564 = vadd.xlane.f32.xlu0 %v563_v36  ;;  %v429_v43 = vpop.f32.mrf.mxu0  ;;  %v469_v44 = vpop.f32.mrf.mxu1  ;;  %v508_v45 = vmax.f32 %v466_v28, 0.0  ;;  %v551_v48 = vmul.f32 %v1045_v35, %v507_v30 }
  0xf3   : > { %v493_v46 = vmax.f32 %v428_v38, 0.0  ;;  %v430_v47 = vadd.f32 %v429_v43, %v1032_v22  ;;  %v509_v49 = vmax.f32 %v468_v42, 0.0  ;;  %v569_v52 = vadd.f32 %v535_v37, %v534_v39 }
  0xf4   : > { %v431_v50 = vpop.f32.mrf.mxu0  ;;  %v471_v51 = vpop.f32.mrf.mxu1  ;;  %v536_v58 = vmul.f32 %v1043_v34, %v492_v41  ;;  %v470_v60 = vadd.f32 %v469_v44, %v1032_v22  ;;  %v552_v63 = vmul.f32 %v1043_v34, %v508_v45  ;;  %v593_v7 = vadd.f32 %v551_v48, %v550_v57 }
  0xf5   : > { %v537_v54 = vmul.f32 %v1045_v35, %v493_v46  ;;  %v432_v55 = vadd.f32 %v431_v50, %v1034_v23  ;;  %v472_v56 = vadd.f32 %v471_v51, %v1034_v23  ;;  %v494_v59 = vmax.f32 %v430_v47, 0.0 }
  0xf6   : > { %570 = vadd.xlane.f32.xlu1 %v569_v52  ;;  %591 = vadd.xlane.f32.xlu0 %v590_v53  ;;  %v435_v61 = vpop.f32.mrf.mxu0  ;;  %v475_v62 = vpop.f32.mrf.mxu1  ;;  %v553_v0 = vmul.f32 %v1045_v35, %v509_v49  ;;  %v510_v13 = vmax.f32 %v470_v60, 0.0  ;;  %v1107_v49 = vstv %s608_s22 }
  0xf7   : > { %v495_v1 = vmax.f32 %v432_v55, 0.0  ;;  %v436_v2 = vadd.f32 %v435_v61, %v1032_v22  ;;  %v511_v3 = vmax.f32 %v472_v56, 0.0  ;;  %v476_v4 = vadd.f32 %v475_v62, %v1032_v22 }
  0xf8   : > { %v437_v5 = vpop.f32.mrf.mxu0  ;;  %v477_v6 = vpop.f32.mrf.mxu1  ;;  %v572_v8 = vadd.f32 %v537_v54, %v536_v58  ;;  %v538_v12 = vmul.f32 %v1043_v34, %v494_v59  ;;  %v596_v19 = vadd.f32 %v553_v0, %v552_v63  ;;  %v554_v32 = vmul.f32 %v1043_v34, %v510_v13 }
  0xf9   : > { %v539_v9 = vmul.f32 %v1045_v35, %v495_v1  ;;  %v496_v10 = vmax.f32 %v436_v2, 0.0  ;;  %v438_v11 = vadd.f32 %v437_v5, %v1034_v23  ;;  %v478_v14 = vadd.f32 %v477_v6, %v1034_v23 }
  0xfa   : > { %594 = vadd.xlane.f32.xlu1 %v593_v7  ;;  %573 = vadd.xlane.f32.xlu0 %v572_v8  ;;  %v439_v15 = vpop.f32.mrf.mxu0  ;;  %v479_v16 = vpop.f32.mrf.mxu1  ;;  %v555_v20 = vmul.f32 %v1045_v35, %v511_v3  ;;  %v512_v21 = vmax.f32 %v476_v4, 0.0 }
  0xfb   : > { %v497_v17 = vmax.f32 %v438_v11, 0.0  ;;  %v440_v18 = vadd.f32 %v439_v15, %v1032_v22  ;;  %v513_v24 = vmax.f32 %v478_v14, 0.0  ;;  %v575_v27 = vadd.f32 %v539_v9, %v538_v12 }
  0xfc   : > { %v441_v25 = vpop.f32.mrf.mxu0  ;;  %v481_v26 = vpop.f32.mrf.mxu1  ;;  %v540_v28 = vmul.f32 %v1043_v34, %v496_v10  ;;  %v480_v33 = vadd.f32 %v479_v16, %v1032_v22  ;;  %v556_v39 = vmul.f32 %v1043_v34, %v512_v21  ;;  %v599_v42 = vadd.f32 %v555_v20, %v554_v32 }
  0xfd   : > { %v541_v29 = vmul.f32 %v1045_v35, %v497_v17  ;;  %v498_v30 = vmax.f32 %v440_v18, 0.0  ;;  %v442_v31 = vadd.f32 %v441_v25, %v1034_v23  ;;  %v482_v36 = vadd.f32 %v481_v26, %v1034_v23 }
  0xfe   : > { %576 = vadd.xlane.f32.xlu1 %v575_v27  ;;  %597 = vadd.xlane.f32.xlu0 %v596_v19  ;;  %v557_v40 = vmul.f32 %v1045_v35, %v513_v24  ;;  %v514_v45 = vmax.f32 %v480_v33, 0.0 }
  0xff   : > { %v499_v37 = vmax.f32 %v442_v31, 0.0  ;;  %v578_v38 = vadd.f32 %v541_v29, %v540_v28  ;;  %v515_v41 = vmax.f32 %v482_v36, 0.0  ;;  %v542_v43 = vmul.f32 %v1043_v34, %v498_v30 }
 0x100   : > { %v602_v46 = vadd.f32 %v557_v40, %v556_v39  ;;  %v558_v47 = vmul.f32 %v1043_v34, %v514_v45 }
 0x101   : > { %v543_v44 = vmul.f32 %v1045_v35, %v499_v37  ;;  %v559_v23 = vmul.f32 %v1045_v35, %v515_v41 }
 0x102   : > { %600 = vadd.xlane.f32.xlu1 %v599_v42  ;;  %579 = vadd.xlane.f32.xlu0 %v578_v38 }
 0x103   : > { %v581_v22 = vadd.f32 %v543_v44, %v542_v43  ;;  %v605_v48 = vadd.f32 %v559_v23, %v558_v47 }
 0x106   : > { %582 = vadd.xlane.f32.xlu1 %v581_v22  ;;  %603 = vadd.xlane.f32.xlu0 %v602_v46 }
 0x10a   : > { %606 = vadd.xlane.f32.xlu1 %v605_v48 }
 0x173   : > { %v562_v50 = vpop.xlane.xlu0 %561 }
 0x174   : > { %v610_v51 = vadd.f32 %v1107_v49, %v562_v50 }
 0x176   : > { %v626_v52 = vsub.f32 0.0, %v610_v51  ;;  %v589_v53 = vpop.xlane.xlu1 %588 }
 0x177   : > { %v586_v54 = vpop.xlane.xlu0 %585  ;;  %v619_v56 = vadd.f32 %v1107_v49, %v589_v53 }
 0x178   : > { %v642_v55 = vmul.f32 1.442695, %v626_v52  ;;  %v618_v35 = vadd.f32 %v1107_v49, %v586_v54 }
 0x179   : > { %v635_v34 = vsub.f32 0.0, %v619_v56 }
 0x17a   : > { %867 = vpow2.f32 %v642_v55  ;;  %v634_v57 = vsub.f32 0.0, %v618_v35 }
 0x17b   : > { %v568_v58 = vpop.xlane.xlu1 %567  ;;  %v565_v59 = vpop.xlane.xlu0 %564  ;;  %v660_v60 = vmul.f32 1.442695, %v635_v34 }
 0x17c   : > { %v658_v61 = vmul.f32 1.442695, %v634_v57  ;;  %v612_v62 = vadd.f32 %v1107_v49, %v568_v58  ;;  %v611_v63 = vadd.f32 %v1107_v49, %v565_v59 }
 0x17d   : > { %869 = vpow2.f32 %v660_v60 }
 0x17e   : > { %v628_v0 = vsub.f32 0.0, %v612_v62  ;;  %v627_v1 = vsub.f32 0.0, %v611_v63  ;;  %871 = vpow2.f32 %v658_v61 }
 0x17f   : > { %v571_v2 = vpop.xlane.xlu1 %570  ;;  %v592_v3 = vpop.xlane.xlu0 %591 }
 0x180   : > { %v646_v4 = vmul.f32 1.442695, %v628_v0  ;;  %v644_v5 = vmul.f32 1.442695, %v627_v1  ;;  %v613_v6 = vadd.f32 %v1107_v49, %v571_v2  ;;  %v620_v7 = vadd.f32 %v1107_v49, %v592_v3 }
 0x182   : > { %873 = vpow2.f32 %v646_v4  ;;  %v629_v8 = vsub.f32 0.0, %v613_v6  ;;  %v636_v9 = vsub.f32 0.0, %v620_v7 }
 0x183   : > { %875 = vpow2.f32 %v644_v5  ;;  %v595_v10 = vpop.xlane.xlu1 %594  ;;  %v574_v11 = vpop.xlane.xlu0 %573 }
 0x184   : > { %v648_v12 = vmul.f32 1.442695, %v629_v8  ;;  %v662_v13 = vmul.f32 1.442695, %v636_v9  ;;  %v621_v14 = vadd.f32 %v1107_v49, %v595_v10  ;;  %v614_v15 = vadd.f32 %v1107_v49, %v574_v11 }
 0x186   : > { %877 = vpow2.f32 %v648_v12  ;;  %v637_v16 = vsub.f32 0.0, %v621_v14  ;;  %v630_v17 = vsub.f32 0.0, %v614_v15 }
 0x187   : > { %v868_v18 = vpop.eup %867  ;;  %879 = vpow2.f32 %v662_v13  ;;  %v577_v19 = vpop.xlane.xlu1 %576 }
 0x188   : > { %v598_v20 = vpop.xlane.xlu0 %597  ;;  %v674_v21 = vadd.f32 1.0, %v868_v18  ;;  %v664_v24 = vmul.f32 1.442695, %v637_v16  ;;  %v650_v25 = vmul.f32 1.442695, %v630_v17  ;;  %v615_v26 = vadd.f32 %v1107_v49, %v577_v19 }
 0x189   : > { %v622_v27 = vadd.f32 %v1107_v49, %v598_v20 }
 0x18a   : > { %881 = vrcp.f32 %v674_v21  ;;  %v631_v28 = vsub.f32 0.0, %v615_v26  ;;  %v870_v29 = vpop.eup %869 }
 0x18b   : > { %883 = vpow2.f32 %v664_v24  ;;  %v638_v30 = vsub.f32 0.0, %v622_v27  ;;  %v601_v31 = vpop.xlane.xlu1 %600  ;;  %v872_v33 = vpop.eup %871  ;;  %v683_v36 = vadd.f32 1.0, %v870_v29 }
 0x18c   : > { %v580_v32 = vpop.xlane.xlu0 %579  ;;  %885 = vpow2.f32 %v650_v25  ;;  %v652_v37 = vmul.f32 1.442695, %v631_v28  ;;  %v623_v38 = vadd.f32 %v1107_v49, %v601_v31  ;;  %v682_v39 = vadd.f32 1.0, %v872_v33 }
 0x18d   : > { %v666_v40 = vmul.f32 1.442695, %v638_v30  ;;  %v616_v41 = vadd.f32 %v1107_v49, %v580_v32  ;;  %887 = vrcp.f32 %v683_v36 }
 0x18e   : > { %v639_v42 = vsub.f32 0.0, %v623_v38  ;;  %889 = vrcp.f32 %v682_v39 }
 0x18f   : > { %v874_v43 = vpop.eup %873  ;;  %v632_v44 = vsub.f32 0.0, %v616_v41  ;;  %v583_v45 = vpop.xlane.xlu1 %582  ;;  %891 = vpow2.f32 %v652_v37 }
 0x190   : > { %v604_v22 = vpop.xlane.xlu0 %603  ;;  %v876_v23 = vpop.eup %875  ;;  %v676_v46 = vadd.f32 1.0, %v874_v43  ;;  %v668_v47 = vmul.f32 1.442695, %v639_v42  ;;  %v617_v48 = vadd.f32 %v1107_v49, %v583_v45  ;;  %893 = vpow2.f32 %v666_v40 }
 0x191   : > { %v675_v50 = vadd.f32 1.0, %v876_v23  ;;  %v654_v51 = vmul.f32 1.442695, %v632_v44  ;;  %v624_v52 = vadd.f32 %v1107_v49, %v604_v22 }
 0x192   : > { %895 = vrcp.f32 %v676_v46  ;;  %v633_v53 = vsub.f32 0.0, %v617_v48 }
 0x193   : > { %v878_v54 = vpop.eup %877  ;;  %897 = vrcp.f32 %v675_v50  ;;  %v640_v55 = vsub.f32 0.0, %v624_v52  ;;  %v607_v56 = vpop.xlane.xlu1 %606 }
 0x194   : > { %v880_v35 = vpop.eup %879  ;;  %v677_v34 = vadd.f32 1.0, %v878_v54  ;;  %899 = vpow2.f32 %v668_v47  ;;  %v656_v57 = vmul.f32 1.442695, %v633_v53  ;;  %v625_v58 = vadd.f32 %v1107_v49, %v607_v56 }
 0x195   : > { %v684_v59 = vadd.f32 1.0, %v880_v35  ;;  %901 = vpow2.f32 %v654_v51  ;;  %v670_v60 = vmul.f32 1.442695, %v640_v55 }
 0x196   : > { %903 = vrcp.f32 %v677_v34  ;;  %v641_v61 = vsub.f32 0.0, %v625_v58 }
 0x197   : > { %v882_v62 = vpop.eup %881  ;;  %905 = vrcp.f32 %v684_v59 }
 0x198   : > { %v884_v63 = vpop.eup %883  ;;  %723 = vst.msk [vmem:[%s1129_s26] sm:$0xff] %vm722_vm1, %v882_v62  ;;  %907 = vpow2.f32 %v656_v57  ;;  %v672_v49 = vmul.f32 1.442695, %v641_v61 }
 0x199   : > { %v886_v0 = vpop.eup %885  ;;  %v685_v1 = vadd.f32 1.0, %v884_v63  ;;  %909 = vpow2.f32 %v670_v60 }
 0x19a   : > { %v678_v2 = vadd.f32 1.0, %v886_v0  ;;  %911 = vpow2.f32 %v672_v49  ;;  %v888_v3 = vpop.eup %887 }
 0x19b   : > { %913 = vrcp.f32 %v685_v1  ;;  %v890_v4 = vpop.eup %889  ;;  %732 = vst.msk [vmem:[%s1129_s26 + $0x48] sm:$0xff] %vm722_vm1, %v888_v3 }
 0x19c   : > { %915 = vrcp.f32 %v678_v2  ;;  %v892_v5 = vpop.eup %891  ;;  %731 = vst.msk [vmem:[%s1129_s26 + $0x40] sm:$0xff] %vm722_vm1, %v890_v4 }
 0x19d   : > { %v894_v6 = vpop.eup %893  ;;  %v679_v7 = vadd.f32 1.0, %v892_v5 }
 0x19e   : > { %v686_v9 = vadd.f32 1.0, %v894_v6 }
 0x19f   : > { %v896_v8 = vpop.eup %895  ;;  %917 = vrcp.f32 %v679_v7 }
 0x1a0   : > { %v898_v10 = vpop.eup %897  ;;  %725 = vst.msk [vmem:[%s1129_s26 + $0x10] sm:$0xff] %vm722_vm1, %v896_v8  ;;  %919 = vrcp.f32 %v686_v9 }
 0x1a1   : > { %v900_v11 = vpop.eup %899  ;;  %724 = vst.msk [vmem:[%s1129_s26 + $0x8] sm:$0xff] %vm722_vm1, %v898_v10 }
 0x1a2   : > { %v902_v12 = vpop.eup %901  ;;  %v687_v13 = vadd.f32 1.0, %v900_v11 }
 0x1a3   : > { %v904_v14 = vpop.eup %903  ;;  %v680_v15 = vadd.f32 1.0, %v902_v12 }
 0x1a4   : > { %v906_v16 = vpop.eup %905  ;;  %726 = vst.msk [vmem:[%s1129_s26 + $0x18] sm:$0xff] %vm722_vm1, %v904_v14  ;;  %921 = vrcp.f32 %v687_v13 }
 0x1a5   : > { %v908_v17 = vpop.eup %907  ;;  %733 = vst.msk [vmem:[%s1129_s26 + $0x50] sm:$0xff] %vm722_vm1, %v906_v16  ;;  %923 = vrcp.f32 %v680_v15 }
 0x1a6   : > { %v910_v18 = vpop.eup %909  ;;  %v681_v19 = vadd.f32 1.0, %v908_v17 }
 0x1a7   : > { %v912_v20 = vpop.eup %911  ;;  %v688_v21 = vadd.f32 1.0, %v910_v18 }
 0x1a8   : > { %v914_v24 = vpop.eup %913  ;;  %925 = vrcp.f32 %v681_v19  ;;  %v689_v25 = vadd.f32 1.0, %v912_v20 }
 0x1a9   : > { %v916_v26 = vpop.eup %915  ;;  %734 = vst.msk [vmem:[%s1129_s26 + $0x58] sm:$0xff] %vm722_vm1, %v914_v24  ;;  %927 = vrcp.f32 %v688_v21 }
 0x1aa   : > { %727 = vst.msk [vmem:[%s1129_s26 + $0x20] sm:$0xff] %vm722_vm1, %v916_v26  ;;  %929 = vrcp.f32 %v689_v25 }
 0x1ac   : > { %v918_v27 = vpop.eup %917 }
 0x1ad   : > { %v920_v28 = vpop.eup %919  ;;  %728 = vst.msk [vmem:[%s1129_s26 + $0x28] sm:$0xff] %vm722_vm1, %v918_v27 }
 0x1ae   : > { %735 = vst.msk [vmem:[%s1129_s26 + $0x60] sm:$0xff] %vm722_vm1, %v920_v28 }
 0x1b1   : > { %v922_v29 = vpop.eup %921 }
 0x1b2   : > { %v924_v30 = vpop.eup %923  ;;  %736 = vst.msk [vmem:[%s1129_s26 + $0x68] sm:$0xff] %vm722_vm1, %v922_v29 }
 0x1b3   : > { %729 = vst.msk [vmem:[%s1129_s26 + $0x30] sm:$0xff] %vm722_vm1, %v924_v30 }
 0x1b5   : > { %v926_v31 = vpop.eup %925 }
 0x1b6   : > { %v928_v32 = vpop.eup %927  ;;  %730 = vst.msk [vmem:[%s1129_s26 + $0x38] sm:$0xff] %vm722_vm1, %v926_v31 }
 0x1b7   : > { %v930_v33 = vpop.eup %929  ;;  %737 = vst.msk [vmem:[%s1129_s26 + $0x70] sm:$0xff] %vm722_vm1, %v928_v32 }
 0x1b8   : > { %738 = vst.msk [vmem:[%s1129_s26 + $0x78] sm:$0xff] %vm722_vm1, %v930_v33 }
 0x1b9 PF: > { %s16_s20 = sadd.s32 1, %s937_s20  }
 0x1ba   : > { %p13_p4 = scmp.ge.s32.totalorder %s16_s20, 4  }
 0x1bc   :  { %15 = sbr.rel (!%p13_p4) target bundleno = 2 (0x2), region = 70 }

</bundles_post_ra>
